<compile_context>
chip_gen: v5e
topology: v5e:2x2
jax: 0.10.0
libtpu: 0.0.40
codegen_flags: <defaults>
</compile_context>

<pallas_src>
import math

import jax
import jax.numpy as jnp
from jax import lax
from jax.experimental import pallas as pl
from jax.experimental.pallas import tpu as pltpu


def _round_up(x, m):
    return ((x + m - 1) // m) * m


def _cdiv(a, b):
    return (a + b - 1) // b


def _linear_bias_kernel(x_ref, w_ref, b_ref, o_ref, acc_ref):
    # x_ref: (tm, tk), w_ref: (tn, tk)  [PyTorch (N, K) layout], b_ref: (1, tn)
    # o_ref: (tm, tn), acc_ref: (tm, tn) f32 scratch, resident across the K axis.
    k = pl.program_id(2)

    @pl.when(k == 0)
    def _():
        # Fold the bias into the accumulator init (removes the epilogue add).
        acc_ref[...] = jnp.broadcast_to(
            b_ref[...].astype(jnp.float32), acc_ref.shape
        )

    acc_ref[...] += lax.dot_general(
        x_ref[...],
        w_ref[...],
        dimension_numbers=(((1,), (1,)), ((), ())),  # contract K of both operands
        preferred_element_type=jnp.float32,
    )

    @pl.when(k == pl.num_programs(2) - 1)
    def _():
        o_ref[...] = acc_ref[...].astype(o_ref.dtype)


def _linear_nobias_kernel(x_ref, w_ref, o_ref, acc_ref):
    k = pl.program_id(2)

    @pl.when(k == 0)
    def _():
        acc_ref[...] = jnp.zeros_like(acc_ref)

    acc_ref[...] += lax.dot_general(
        x_ref[...],
        w_ref[...],
        dimension_numbers=(((1,), (1,)), ((), ())),
        preferred_element_type=jnp.float32,
    )

    @pl.when(k == pl.num_programs(2) - 1)
    def _():
        o_ref[...] = acc_ref[...].astype(o_ref.dtype)


def simple_linear(x, weight, bias=None, *, tm=512, tn=512, tk=1024, mxu_dtype=None):
    """Equivalent of F.linear(x, weight, bias) via a tiled Pallas TPU kernel.

    x:      (..., in_features)
    weight: (out_features, in_features)   (PyTorch layout, used as-is)
    bias:   (out_features,) or None
    mxu_dtype: optional cast for the matmul operands (e.g. jnp.bfloat16);
               accumulation / bias stay f32. None keeps the input dtype.
    """
    *lead, K = x.shape
    N, Kw = weight.shape
    assert Kw == K, f"weight in_features {Kw} != input last dim {K}"
    M = 1
    for d in lead:
        M *= d

    out_dtype = x.dtype
    x2d = x.reshape(M, K)
    w = weight  # keep (N, K): no transpose copy on the hot path
    if mxu_dtype is not None:
        x2d = x2d.astype(mxu_dtype)
        w = w.astype(mxu_dtype)

    # Adaptive tiles: shrink for small problems; keep the lane dim a multiple
    # of 128 and the sublane dim a multiple of 8 (BlockSpec (8,128) rule).
    tm = max(8, min(tm, _round_up(M, 8)))
    tn = max(128, min(tn, _round_up(N, 128)))

    # Longer K tiles => fewer accumulator read-modify-writes and fewer grid
    # steps. Use the whole (128-rounded) K when it is small enough.
    k128 = _round_up(K, 128)
    tk = k128 if k128 <= 2048 else min(tk, 1024)
    Kp = _round_up(K, tk)

    # Zero-pad ONLY the contracted K dim (exact for matmul).  M/N edges are
    # handled by Pallas partial-block masking of the output store, so there is
    # no x padding and no post-kernel slice copy.
    if Kp != K:
        x2d = jnp.pad(x2d, ((0, 0), (0, Kp - K)))
        w = jnp.pad(w, ((0, 0), (0, Kp - K)))

    # Give the v7x megacore (2 TensorCores) at least two parallel (i, j)
    # blocks when the problem is big enough to be worth splitting.
    if _cdiv(M, tm) * _cdiv(N, tn) == 1 and M * N * Kp >= (1 << 24):
        if M >= 256:
            tm = _round_up(_cdiv(M, 2), 8)
        elif N >= 256:
            tn = _round_up(_cdiv(N, 2), 128)

    grid_m, grid_n, grid_k = _cdiv(M, tm), _cdiv(N, tn), Kp // tk
    grid = (grid_m, grid_n, grid_k)

    in_itemsize = jnp.dtype(x2d.dtype).itemsize
    out_itemsize = jnp.dtype(out_dtype).itemsize

    # HBM bytes actually streamed, including re-streaming: x is read once per
    # N tile, the weight once per M tile.
    bytes_accessed = (
        M * Kp * in_itemsize * grid_n
        + N * Kp * in_itemsize * grid_m
        + M * N * out_itemsize
    )
    if bias is not None:
        bytes_accessed += N * jnp.dtype(bias.dtype).itemsize * grid_m * grid_n
    cost = pl.CostEstimate(
        flops=2 * M * N * Kp, transcendentals=0, bytes_accessed=int(bytes_accessed)
    )

    # VMEM budget: double-buffered x/w/out tiles + f32 accumulator (+ bias).
    vmem_need = (
        2 * (tm * tk + tn * tk) * in_itemsize
        + 2 * tm * tn * out_itemsize
        + tm * tn * 4
        + 2 * tn * 4
    )
    # 48 MiB scoped limit is safe on every generation (v7x has 64 MiB physical).
    vmem_limit = min(max(32 << 20, 2 * vmem_need), 48 << 20)

    compiler_params = pltpu.CompilerParams(
        # M/N tiles parallel (megacore sharding); K reduction last + arbitrary
        # so the f32 accumulator stays resident across it.
        dimension_semantics=("parallel", "parallel", "arbitrary"),
        vmem_limit_bytes=vmem_limit,
    )

    x_spec = pl.BlockSpec((tm, tk), lambda i, j, k: (i, k))
    w_spec = pl.BlockSpec((tn, tk), lambda i, j, k: (j, k))   # (N, K) layout
    out_spec = pl.BlockSpec((tm, tn), lambda i, j, k: (i, j))
    scratch = [pltpu.VMEM((tm, tn), jnp.float32)]
    out_shape = jax.ShapeDtypeStruct((M, N), out_dtype)

    if bias is not None:
        b2d = bias.reshape(1, N)
        out = pl.pallas_call(
            _linear_bias_kernel,
            out_shape=out_shape,
            grid_spec=pltpu.PrefetchScalarGridSpec(
                num_scalar_prefetch=0,
                grid=grid,
                in_specs=[
                    x_spec,
                    w_spec,
                    pl.BlockSpec((1, tn), lambda i, j, k: (0, j)),
                ],
                out_specs=out_spec,
                scratch_shapes=scratch,
            ),
            compiler_params=compiler_params,
            cost_estimate=cost,
        )(x2d, w, b2d)
    else:
        out = pl.pallas_call(
            _linear_nobias_kernel,
            out_shape=out_shape,
            grid_spec=pltpu.PrefetchScalarGridSpec(
                num_scalar_prefetch=0,
                grid=grid,
                in_specs=[x_spec, w_spec],
                out_specs=out_spec,
                scratch_shapes=scratch,
            ),
            compiler_params=compiler_params,
            cost_estimate=cost,
        )(x2d, w)

    return out.reshape(*lead, N)


def init_params(key, in_features, out_features, dtype=jnp.float32):
    # kaiming_uniform_(weight, nonlinearity='linear'):
    #   gain = 1, fan_in = in_features, bound = gain * sqrt(3 / fan_in)
    bound = math.sqrt(3.0 / in_features)
    weight = jax.random.uniform(
        key, (out_features, in_features), dtype=dtype, minval=-bound, maxval=bound
    )
    bias = jnp.zeros((out_features,), dtype=dtype)  # constant_(bias, 0)
    return weight, bias


if __name__ == "__main__":
    in_features, out_features = 32, 64
    batch, seq = 2, 8  # leading dims; F.linear applies over the last dim

    key = jax.random.PRNGKey(0)
    kx, kw = jax.random.split(key)

    x = jax.random.normal(kx, (batch, seq, in_features), dtype=jnp.float32)
    weight, bias = init_params(kw, in_features, out_features)

    out = simple_linear(x, weight, bias)
    out = jax.block_until_ready(out)

    # reference check in plain JAX (bias path)
    ref = jnp.einsum("bsk,nk->bsn", x, weight) + bias
    assert out.shape == (batch, seq, out_features)
    assert jnp.allclose(out, ref, atol=1e-5, rtol=1e-5)

    # also exercise the bias=None fast path
    out_nb = jax.block_until_ready(simple_linear(x, weight, None))
    ref_nb = jnp.einsum("bsk,nk->bsn", x, weight)
    assert jnp.allclose(out_nb, ref_nb, atol=1e-5, rtol=1e-5)

    print("KERNEL_OK")
</pallas_src>

<mosaic_0001>
module attributes {stable_mosaic.version = 11 : i64} {
  func.func @_linear_bias_kernel(%arg0: i32, %arg1: i32, %arg2: i32, %arg3: memref<16x128xf32, #tpu.memory_space<vmem>>, %arg4: memref<128x128xf32, #tpu.memory_space<vmem>>, %arg5: memref<1x128xf32, #tpu.memory_space<vmem>>, %arg6: memref<16x128xf32, #tpu.memory_space<vmem>>, %arg7: memref<16x128xf32, #tpu.memory_space<vmem>>) attributes {dimension_semantics = [#tpu.dimension_semantics<parallel>, #tpu.dimension_semantics<parallel>, #tpu.dimension_semantics<arbitrary>], iteration_bounds = array<i64: 1, 1, 1>, scalar_prefetch = 0 : i64, scratch_operands = 1 : i64, tpu.core_type = #tpu.core_type<tc>, window_params = [{transform_indices = @transform_0, window_bounds = array<i64: 16, 128>}, {transform_indices = @transform_1, window_bounds = array<i64: 128, 128>}, {transform_indices = @transform_2, window_bounds = array<i64: 1, 128>}, {transform_indices = @transform_3, window_bounds = array<i64: 16, 128>}]} {
    %c0_i32 = arith.constant 0 : i32
    %0 = arith.cmpi eq, %arg2, %c0_i32 : i32
    %1 = arith.extui %0 : i1 to i32
    %c0_i32_0 = arith.constant 0 : i32
    %2 = arith.cmpi ne, %1, %c0_i32_0 : i32
    scf.if %2 {
      %c0_10 = arith.constant 0 : index
      %c0_11 = arith.constant 0 : index
      %12 = vector.load %arg5[%c0_10, %c0_11] : memref<1x128xf32, #tpu.memory_space<vmem>>, vector<1x128xf32>
      %13 = vector.shape_cast %12 : vector<1x128xf32> to vector<1x128xf32>
      %14 = vector.broadcast %13 : vector<1x128xf32> to vector<16x128xf32>
      %c0_12 = arith.constant 0 : index
      %c0_13 = arith.constant 0 : index
      %15 = vector.load %arg7[%c0_12, %c0_13] : memref<16x128xf32, #tpu.memory_space<vmem>>, vector<16x128xf32>
      tpu.vector_store %arg7[%c0_12, %c0_13], %14 {strides = array<i32>} : memref<16x128xf32, #tpu.memory_space<vmem>>, vector<16x128xf32>,
    } else {
    }
    %c0 = arith.constant 0 : index
    %c0_1 = arith.constant 0 : index
    %3 = vector.load %arg7[%c0, %c0_1] : memref<16x128xf32, #tpu.memory_space<vmem>>, vector<16x128xf32>
    %c0_2 = arith.constant 0 : index
    %c0_3 = arith.constant 0 : index
    %4 = vector.load %arg3[%c0_2, %c0_3] : memref<16x128xf32, #tpu.memory_space<vmem>>, vector<16x128xf32>
    %c0_4 = arith.constant 0 : index
    %c0_5 = arith.constant 0 : index
    %5 = vector.load %arg4[%c0_4, %c0_5] : memref<128x128xf32, #tpu.memory_space<vmem>>, vector<128x128xf32>
    %cst = arith.constant dense<0.000000e+00> : vector<16x128xf32>
    %6 = tpu.matmul %4, %5, %cst {dimension_numbers = #tpu.dot_dimension_numbers<[1], [1], [0], [0], [0, 0, 1, 0], [], []>} : vector<16x128xf32>, vector<128x128xf32>, vector<16x128xf32> -> vector<16x128xf32>
    %7 = arith.addf %3, %6 : vector<16x128xf32>
    %c0_6 = arith.constant 0 : index
    %c0_7 = arith.constant 0 : index
    %8 = vector.load %arg7[%c0_6, %c0_7] : memref<16x128xf32, #tpu.memory_space<vmem>>, vector<16x128xf32>
    tpu.vector_store %arg7[%c0_6, %c0_7], %7 {strides = array<i32>} : memref<16x128xf32, #tpu.memory_space<vmem>>, vector<16x128xf32>,
    %c0_i32_8 = arith.constant 0 : i32
    %9 = arith.cmpi eq, %arg2, %c0_i32_8 : i32
    %10 = arith.extui %9 : i1 to i32
    %c0_i32_9 = arith.constant 0 : i32
    %11 = arith.cmpi ne, %10, %c0_i32_9 : i32
    scf.if %11 {
      %c0_10 = arith.constant 0 : index
      %c0_11 = arith.constant 0 : index
      %12 = vector.load %arg7[%c0_10, %c0_11] : memref<16x128xf32, #tpu.memory_space<vmem>>, vector<16x128xf32>
      %c0_12 = arith.constant 0 : index
      %c0_13 = arith.constant 0 : index
      %13 = vector.load %arg6[%c0_12, %c0_13] : memref<16x128xf32, #tpu.memory_space<vmem>>, vector<16x128xf32>
      tpu.vector_store %arg6[%c0_12, %c0_13], %12 {strides = array<i32>} : memref<16x128xf32, #tpu.memory_space<vmem>>, vector<16x128xf32>,
    } else {
    }
    return
  }
  func.func @transform_0(%arg0: i32, %arg1: i32, %arg2: i32) -> (i32, i32) {
    %c0_i32 = arith.constant 0 : i32
    return %arg0, %arg2 : i32, i32
  }
  func.func @transform_1(%arg0: i32, %arg1: i32, %arg2: i32) -> (i32, i32) {
    %c0_i32 = arith.constant 0 : i32
    return %arg1, %arg2 : i32, i32
  }
  func.func @transform_2(%arg0: i32, %arg1: i32, %arg2: i32) -> (i32, i32) {
    %c0_i32 = arith.constant 0 : i32
    %c0_i32_0 = arith.constant 0 : i32
    return %c0_i32, %arg1 : i32, i32
  }
  func.func @transform_3(%arg0: i32, %arg1: i32, %arg2: i32) -> (i32, i32) {
    %c0_i32 = arith.constant 0 : i32
    return %arg0, %arg1 : i32, i32
  }
}

</mosaic_0001>

<bundles_post_ra>
// kernel: tpu_custom_call.1
= control target key start
LH: loop header
LB: loop body
LE: loop exit
PB: predicated region body
PF: predicated region fallthrough
CT: control target
= control target key end

     0   :  { %8 = vsyncpa [#allocation4], 0  ;;  %s277_s0 = inlined_call_operand.hbm [shape: f32[16,128], index: 0, kind: input, shape index: {}]   ;;  %s278_s1 = inlined_call_operand.hbm [shape: f32[64,128], index: 1, kind: input, shape index: {}]   ;;  %s279_s2 = inlined_call_operand.vmem [shape: f32[1,64], index: 2, kind: input, shape index: {}]   ;;  %s280_s3 = inlined_call_operand.hbm [shape: f32[16,64], index: 3, kind: output, shape index: {}]  }
   0x1   :  { %9 = vsyncpa [#allocation7], 0 }
   0x2   :  { %10 = vsyncpa [#allocation5], 0  ;;  %s15_s14 = sshll.u32 %s277_s0, 4  ;;  %s231_s15 = smov [#allocation3]   ;;  %s16_s14 = int_to_ptr.hbm [resolvable:$true] %s15_s14 }
   0x3   :  { %s17_s16 = sshll.u32 %s231_s15, 4  ;;  %s232_s17 = smov 128   ;;  %s18_s16 = int_to_ptr.vmem [resolvable:$true] %s17_s16 }
   0x4   :  { %s233_s18 = smov 8  }
   0x5   :  { %23 = dma.hbm_to_vmem [thread:$0]  %s16_s14, 256, %s18_s16, [#allocation4], %s232_s17, %s232_s17, %s233_s18  }
   0x6   :  { %27 = vsyncadd [#allocation7], 1024  ;;  %s28_s21 = sshll.u32 %s278_s1, 4  ;;  %s234_s22 = smov [#allocation6]   ;;  %s29_s21 = int_to_ptr.hbm [resolvable:$true] %s28_s21 }
   0x7   :  { %s30_s23 = sshll.u32 %s234_s22, 4  ;;  %s31_s23 = int_to_ptr.vmem [resolvable:$true] %s30_s23 }
   0x8   :  { %36 = dma.hbm_to_vmem [thread:$0]  %s29_s21, 1024, %s31_s23, [#allocation7], %s232_s17, %s232_s17, %s233_s18  }
   0x9   :  { %225 = dma.done.wait [#allocation4], 256  }
   0xa   :  { %226 = vsyncadd [#allocation4], 4294967040 }
   0xb   :  { %227 = dma.done.wait [#allocation7], 2048  }
   0xc   :  { %228 = vsyncadd [#allocation7], 4294965248  ;;  %v76_v0 = vld [vmem:[#allocation6 + $0x78] sm:$0xff]  ;;  %v75_v1 = vld [vmem:[#allocation6 + $0x70] sm:$0xff]  ;;  %s235_s24 = smov [#allocation8]   ;;  %s117_s28 = sshll.u32 %s280_s3, 4  ;;  %s118_s28 = int_to_ptr.hbm [resolvable:$true] %s117_s28 }
   0xd   :  { %77 = vmatpush.xpose.msra.mxu0 %v76_v0  ;;  %131 = vmatpush.xpose.msra.mxu1 %v76_v0  ;;  %v74_v2 = vld [vmem:[#allocation6 + $0x68] sm:$0xff]  ;;  %v73_v3 = vld [vmem:[#allocation6 + $0x60] sm:$0xff]  ;;  %v72_v4 = vld [vmem:[#allocation6 + $0x58] sm:$0xff]  ;;  %s115_s25 = sshll.u32 %s235_s24, 4  ;;  %s116_s25 = int_to_ptr.vmem [resolvable:$true] %s115_s25 }
   0xe   :  { %v71_v5 = vld [vmem:[#allocation6 + $0x50] sm:$0xff]  ;;  %v70_v6 = vld [vmem:[#allocation6 + $0x48] sm:$0xff]  ;;  %v69_v7 = vld [vmem:[#allocation6 + $0x40] sm:$0xff] }
   0xf   :  { %v68_v8 = vld [vmem:[#allocation6 + $0x38] sm:$0xff]  ;;  %v67_v9 = vld [vmem:[#allocation6 + $0x30] sm:$0xff]  ;;  %v66_v10 = vld [vmem:[#allocation6 + $0x28] sm:$0xff] }
  0x10   :  { %v65_v11 = vld [vmem:[#allocation6 + $0x20] sm:$0xff]  ;;  %v64_v12 = vld [vmem:[#allocation6 + $0x18] sm:$0xff]  ;;  %v63_v13 = vld [vmem:[#allocation6 + $0x10] sm:$0xff] }
  0x11   :  { %78 = vmatpush.xpose.msra.mxu0 %v75_v1  ;;  %132 = vmatpush.xpose.msra.mxu1 %v75_v1  ;;  %v62_v14 = vld [vmem:[#allocation6 + $0x8] sm:$0xff]  ;;  %v61_v15 = vld [vmem:[#allocation6] sm:$0xff]  ;;  %v59_v16 = vld [vmem:[#allocation3] sm:$0xff] }
  0x12   :  { %v60_v17 = vld [vmem:[#allocation3 + $0x8] sm:$0xff]  ;;  %v152_v18 = vld [vmem:[%s279_s2] ss:$0 sm:$0xff] }
  0x15   :  { %79 = vmatpush.xpose.msra.mxu0 %v74_v2  ;;  %133 = vmatpush.xpose.msra.mxu1 %v74_v2 }
  0x19   :  { %80 = vmatpush.xpose.msra.mxu0 %v73_v3  ;;  %134 = vmatpush.xpose.msra.mxu1 %v73_v3 }
  0x1d   :  { %81 = vmatpush.xpose.msra.mxu0 %v72_v4  ;;  %135 = vmatpush.xpose.msra.mxu1 %v72_v4 }
  0x21   :  { %82 = vmatpush.xpose.msra.mxu0 %v71_v5  ;;  %136 = vmatpush.xpose.msra.mxu1 %v71_v5 }
  0x25   :  { %83 = vmatpush.xpose.msra.mxu0 %v70_v6  ;;  %137 = vmatpush.xpose.msra.mxu1 %v70_v6 }
  0x29   :  { %84 = vmatpush.xpose.msra.mxu0 %v69_v7  ;;  %138 = vmatpush.xpose.msra.mxu1 %v69_v7 }
  0x2d   :  { %85 = vmatpush.xpose.msra.mxu0 %v68_v8  ;;  %139 = vmatpush.xpose.msra.mxu1 %v68_v8 }
  0x31   :  { %86 = vmatpush.xpose.msra.mxu0 %v67_v9  ;;  %140 = vmatpush.xpose.msra.mxu1 %v67_v9 }
  0x35   :  { %87 = vmatpush.xpose.msra.mxu0 %v66_v10  ;;  %141 = vmatpush.xpose.msra.mxu1 %v66_v10 }
  0x39   :  { %88 = vmatpush.xpose.msra.mxu0 %v65_v11  ;;  %142 = vmatpush.xpose.msra.mxu1 %v65_v11 }
  0x3d   :  { %89 = vmatpush.xpose.msra.mxu0 %v64_v12  ;;  %143 = vmatpush.xpose.msra.mxu1 %v64_v12 }
  0x41   :  { %90 = vmatpush.xpose.msra.mxu0 %v63_v13  ;;  %144 = vmatpush.xpose.msra.mxu1 %v63_v13 }
  0x45   :  { %91 = vmatpush.xpose.msra.mxu0 %v62_v14  ;;  %145 = vmatpush.xpose.msra.mxu1 %v62_v14 }
  0x49   :  { %92 = vmatpush.xpose.msra.mxu0 %v61_v15  ;;  %146 = vmatpush.xpose.msra.mxu1 %v61_v15 }
  0x4c   :  { %93 = vmatmul.f32.vlgmr.msra.gmra.mxu0 %v59_v16  ;;  %96 = vmatmul.f32.vlgmr.msra.gmra.mxu1 %v60_v17 }
  0xc9   :  { %v94_v19 = vpop.f32.mrf.mxu0  ;;  %v97_v20 = vpop.f32.mrf.mxu1 }
  0xca   :  { %v100_v21 = vadd.f32 %v152_v18, %v94_v19  ;;  %v101_v22 = vadd.f32 %v152_v18, %v97_v20 }
  0xcc   :  { %109 = vst [vmem:[#allocation8] sm:$0xff] %v100_v21 }
  0xcd   :  { %110 = vst [vmem:[#allocation8 + $0x8] sm:$0xff] %v101_v22 }
  0xce   :  { %123 = dma.vmem_to_hbm [thread:$0]  %s116_s25, 256, %s118_s28, [#allocation5], %s232_s17, %s232_s17, %s233_s18  }
  0xcf   :  { %229 = dma.done.wait [#allocation5], 256  }
  0xd0   :  { %230 = vsyncadd [#allocation5], 4294967040 }
  0xd1   :  { %128 = vsyncpa [#allocation4], 1 }
  0xd2   :  { %129 = vsyncpa [#allocation7], 1 }
  0xd3   :  { %130 = vsyncpa [#allocation5], 1 }

</bundles_post_ra>
